<compile_context>
chip_gen: v5e
topology: v5e:2x2
jax: 0.10.0
libtpu: 0.0.40
codegen_flags: <defaults>
</compile_context>

<pallas_src>
import functools

import jax
import jax.numpy as jnp
from jax.experimental import pallas as pl
from jax.experimental.pallas import tpu as pltpu

_SENTINEL = 1.0e6  # padded events / dots land far outside any vicinity


def _round_up(x, m):
    return ((x + m - 1) // m) * m


# --------------------------------------------------------------------------
# Kernel 1: per-event vicinity reduction -> per-core (Dp, 1) partial sums
# --------------------------------------------------------------------------
def _event_reduce_kernel(ev_ref, cc_ref, ndx_ref, ndy_ref, accx_ref, accy_ref,
                         *, Dp, chunk, n_chunks, radius):
    e = pl.program_id(1)

    @pl.when(e == 0)
    def _init():
        accx_ref[...] = jnp.zeros_like(accx_ref)
        accy_ref[...] = jnp.zeros_like(accy_ref)

    cc = cc_ref[...]                      # (Dp, 2): col 0 = y-center, col 1 = x-center
    cx = cc[:, 1:2]                       # (Dp, 1)
    cy = cc[:, 0:1]                       # (Dp, 1)

    r2 = radius * radius
    coef = 2.5 * radius
    lo = radius - 12.5                    # trace-time constant

    def body(i, carry):
        ax, ay = carry
        start = pl.multiple_of(i * chunk, chunk)
        ev = ev_ref[:, pl.ds(start, chunk)]         # (2, chunk)
        ex = ev[0:1, :]                             # (1, chunk)
        ey = ev[1:2, :]
        dx = ex - cx                                # (Dp, chunk)
        dy = ey - cy
        d2 = dx * dx + dy * dy
        # decision_filter in squared-distance space (no sqrt / divide)
        filt = d2 > r2
        if lo > 0.0:
            filt = jnp.logical_or(filt, d2 <= lo * lo)
        elif lo == 0.0:
            filt = jnp.logical_or(filt, d2 <= 0.0)
        inv = jax.lax.rsqrt(jnp.maximum(d2, 1.0))   # EUP rsqrt
        # dtx = 2*(dx - 1.25*r*dx/dist) == dx * (2 - 2.5*r/dist)
        factor = 2.0 - coef * inv
        keep = jnp.where(filt, 0.0, factor)         # filtered events -> 0
        ax = ax + dx * keep
        ay = ay + dy * keep
        return ax, ay

    zeros = jnp.zeros((Dp, chunk), jnp.float32)
    ax, ay = jax.lax.fori_loop(0, n_chunks, body, (zeros, zeros), unroll=True)

    accx_ref[...] += ax                   # lane-dense VALU accumulate
    accy_ref[...] += ay

    @pl.when(e == pl.num_programs(1) - 1)
    def _finalize():
        ndx_ref[0] = jnp.sum(accx_ref[...], axis=1, keepdims=True)   # (Dp, 1)
        ndy_ref[0] = jnp.sum(accy_ref[...], axis=1, keepdims=True)


# --------------------------------------------------------------------------
# Kernel 2: combine per-core partials + pairwise-center regularization
# --------------------------------------------------------------------------
def _finalize_kernel(ndxp_ref, ndyp_ref, cc_ref, cct_ref, pm_ref, pd_ref,
                     out_ref, *, NC, Dp, reg_factor):
    ndx = ndxp_ref[0]                     # (Dp, 1)  normal_dx_update
    ndy = ndyp_ref[0]
    for c in range(1, NC):
        ndx = ndx + ndxp_ref[c]
        ndy = ndy + ndyp_ref[c]

    update = (ndx != 0.0).astype(jnp.float32)

    cc = cc_ref[...]                      # (Dp, 2)
    cx = cc[:, 1:2]
    cy = cc[:, 0:1]
    cct = cct_ref[...]                    # (2, Dp) centers transposed (wrapper glue)
    rx = cct[1:2, :]                      # (1, Dp)
    ry = cct[0:1, :]
    dxc = rx - cx                         # (Dp, Dp): cx[j] - cx[i]
    dyc = ry - cy
    pm = pm_ref[...]                      # pairwise_dists_mask
    pd = pd_ref[...]                      # pairwise_dists
    sdx = dxc * pm
    sdy = dyc * pm
    radi = sdx * sdx + sdy * sdy - pd * pd
    dtxc = 4.0 * dxc * radi
    dtyc = 4.0 * dyc * radi
    corr = 8.0 / jnp.sum(pm, axis=1, keepdims=True)               # (Dp, 1)
    cdx = corr * update * jnp.sum(dtxc, axis=1, keepdims=True)
    cdy = corr * update * jnp.sum(dtyc, axis=1, keepdims=True)

    new_cx = cx - 200.0 * 1.5e-05 * jnp.clip(ndx, -400.0, 400.0) \
             + reg_factor * 2.5e-07 * cdx
    new_cy = cy - 200.0 * 1.5e-05 * jnp.clip(ndy, -400.0, 400.0) \
             + reg_factor * 2.5e-07 * cdy

    # assemble (Dp, 2): col 0 = y, col 1 = x (single full-block store)
    lane = jax.lax.broadcasted_iota(jnp.int32, (Dp, 2), 1)
    out_ref[...] = jnp.where(lane == 0,
                             jnp.broadcast_to(new_cy, (Dp, 2)),
                             jnp.broadcast_to(new_cx, (Dp, 2)))


# --------------------------------------------------------------------------
# Wrapper
# --------------------------------------------------------------------------
def dot_tracking_forward(events_x, events_y, calib_center,
                         pairwise_dists_mask, pairwise_dists,
                         *, calib_radius, dot_regularization_factor,
                         event_tile=8192, chunk=512, num_core_splits=2):
    D = int(calib_center.shape[0])
    E = int(events_x.shape[0])
    NC = max(1, int(num_core_splits))

    # sub-chunk (lanes per inner-loop step) and event tile (lanes per DMA)
    chunk = _round_up(max(int(chunk), 128), 128)
    te = _round_up(min(max(int(event_tile), chunk),
                       _round_up(max(E, 1), chunk)), chunk)
    e_pad = _round_up(max(E, 1), NC * te)
    tiles_per_core = e_pad // (NC * te)
    n_chunks = te // chunk

    # pad the dot axis to whole sublanes; sentinel dots contribute exactly 0
    Dp = _round_up(max(D, 8), 8)

    ex = events_x.astype(jnp.float32)
    ey = events_y.astype(jnp.float32)
    if e_pad != E:
        padv = jnp.full((e_pad - E,), _SENTINEL, jnp.float32)
        ex = jnp.concatenate([ex, padv])
        ey = jnp.concatenate([ey, padv])
    ev = jnp.stack([ex, ey], axis=0)                      # (2, e_pad) fused events

    cc = calib_center.astype(jnp.float32)                 # (D, 2)
    pm = pairwise_dists_mask.astype(jnp.float32)
    pd = pairwise_dists.astype(jnp.float32)
    if Dp != D:
        pad_d = Dp - D
        cc = jnp.concatenate(
            [cc, jnp.full((pad_d, 2), _SENTINEL, jnp.float32)], axis=0)
        pm = jnp.pad(pm, ((0, pad_d), (0, pad_d)))
        # self-mask on padded rows keeps corr = 8 / rowsum finite (their
        # update flag is 0, so they still contribute nothing)
        idx = jnp.arange(D, Dp)
        pm = pm.at[idx, idx].set(1.0)
        pd = jnp.pad(pd, ((0, pad_d), (0, pad_d)))
    cct = cc.T                                            # (2, Dp) glue transpose

    reduce_kernel = functools.partial(
        _event_reduce_kernel, Dp=Dp, chunk=chunk, n_chunks=n_chunks,
        radius=float(calib_radius))

    ndx_part, ndy_part = pl.pallas_call(
        reduce_kernel,
        out_shape=(jax.ShapeDtypeStruct((NC, Dp, 1), jnp.float32),
                   jax.ShapeDtypeStruct((NC, Dp, 1), jnp.float32)),
        grid=(NC, tiles_per_core),
        in_specs=[
            pl.BlockSpec((2, te), lambda c, e: (0, c * tiles_per_core + e)),
            pl.BlockSpec((Dp, 2), lambda c, e: (0, 0)),   # centers (resident)
        ],
        out_specs=(pl.BlockSpec((1, Dp, 1), lambda c, e: (c, 0, 0)),
                   pl.BlockSpec((1, Dp, 1), lambda c, e: (c, 0, 0))),
        scratch_shapes=[pltpu.VMEM((Dp, chunk), jnp.float32),   # ndx lane-partials
                        pltpu.VMEM((Dp, chunk), jnp.float32)],  # ndy lane-partials
        compiler_params=pltpu.CompilerParams(
            dimension_semantics=("parallel", "arbitrary")),
        cost_estimate=pl.CostEstimate(
            flops=12 * Dp * e_pad,
            transcendentals=Dp * e_pad,
            bytes_accessed=2 * e_pad * 4 + Dp * 2 * 4 + 2 * NC * Dp * 4),
    )(ev, cc)

    fin_kernel = functools.partial(
        _finalize_kernel, NC=NC, Dp=Dp,
        reg_factor=float(dot_regularization_factor))

    out = pl.pallas_call(
        fin_kernel,
        out_shape=jax.ShapeDtypeStruct((Dp, 2), jnp.float32),
        grid=(1,),
        in_specs=[
            pl.BlockSpec((NC, Dp, 1), lambda i: (0, 0, 0)),
            pl.BlockSpec((NC, Dp, 1), lambda i: (0, 0, 0)),
            pl.BlockSpec((Dp, 2), lambda i: (0, 0)),
            pl.BlockSpec((2, Dp), lambda i: (0, 0)),
            pl.BlockSpec((Dp, Dp), lambda i: (0, 0)),
            pl.BlockSpec((Dp, Dp), lambda i: (0, 0)),
        ],
        out_specs=pl.BlockSpec((Dp, 2), lambda i: (0, 0)),
    )(ndx_part, ndy_part, cc, cct, pm, pd)

    return out[:D]


# --------------------------------------------------------------------------
# Plain-JAX reference mirroring the PyTorch forward pass
# --------------------------------------------------------------------------
def reference_forward(events_x, events_y, calib_center,
                      pairwise_dists_mask, pairwise_dists,
                      *, calib_radius, dot_regularization_factor):
    r = float(calib_radius)
    cx = calib_center[:, 1][:, None]
    cy = calib_center[:, 0][:, None]
    dx = events_x[None, :].astype(jnp.float32) - cx
    dy = events_y[None, :].astype(jnp.float32) - cy
    dist = jnp.sqrt(dx ** 2 + dy ** 2)
    filt = (dist > r) | (dist <= r - 12.5)
    dx = jnp.where(filt, 0.0, dx)
    dy = jnp.where(filt, 0.0, dy)
    dist = jnp.where(dist < 1.0, 1.0, dist)
    dist = jnp.where(filt, 10.0, dist)
    dtx = 2.0 * (dx - r * 1.25 * dx / dist)
    dty = 2.0 * (dy - r * 1.25 * dy / dist)
    ndx = jnp.sum(dtx, axis=1)
    ndy = jnp.sum(dty, axis=1)
    upd = (ndx != 0.0).astype(jnp.float32)
    cxv = calib_center[:, 1]
    cyv = calib_center[:, 0]
    dxc = cxv[None, :] - cxv[:, None]
    dyc = cyv[None, :] - cyv[:, None]
    sdx = dxc * pairwise_dists_mask
    sdy = dyc * pairwise_dists_mask
    radi = sdx ** 2 + sdy ** 2 - pairwise_dists ** 2
    dtxc = 4.0 * dxc * radi
    dtyc = 4.0 * dyc * radi
    corr = 8.0 / jnp.sum(pairwise_dists_mask, axis=1)
    cdx = corr * upd * jnp.sum(dtxc, axis=1)
    cdy = corr * upd * jnp.sum(dtyc, axis=1)
    new_cx = cxv - 200.0 * 1.5e-05 * jnp.clip(ndx, -400.0, 400.0) \
             + dot_regularization_factor * 2.5e-07 * cdx
    new_cy = cyv - 200.0 * 1.5e-05 * jnp.clip(ndy, -400.0, 400.0) \
             + dot_regularization_factor * 2.5e-07 * cdy
    return jnp.stack([new_cy, new_cx], axis=1)


if __name__ == "__main__":
    D, E = 8, 3000            # E not a multiple of the tile -> sentinel padding
    CALIB_RADIUS = 10.0
    REG_FACTOR = 1.0

    key = jax.random.PRNGKey(0)
    k = jax.random.split(key, 4)
    events_x = jax.random.uniform(k[0], (E,), jnp.float32, 0.0, 100.0)
    events_y = jax.random.uniform(k[1], (E,), jnp.float32, 0.0, 100.0)
    calib_center = jax.random.uniform(k[2], (D, 2), jnp.float32, 30.0, 70.0)
    pairwise_dists_mask = (jnp.ones((D, D), jnp.float32)
                           - jnp.eye(D, dtype=jnp.float32))
    pairwise_dists = jax.random.uniform(k[3], (D, D), jnp.float32, 10.0, 30.0)

    # small tile / chunk so the demo exercises the 2x2 grid and the unrolled
    # 4-chunk inner loop; production defaults are event_tile=8192, chunk=512.
    out_cc = dot_tracking_forward(
        events_x, events_y, calib_center, pairwise_dists_mask, pairwise_dists,
        calib_radius=CALIB_RADIUS, dot_regularization_factor=REG_FACTOR,
        event_tile=1024, chunk=256, num_core_splits=2)
    jax.block_until_ready(out_cc)

    ref_cc = reference_forward(
        events_x, events_y, calib_center, pairwise_dists_mask, pairwise_dists,
        calib_radius=CALIB_RADIUS, dot_regularization_factor=REG_FACTOR)

    assert jnp.allclose(out_cc, ref_cc, atol=1e-3, rtol=1e-3), (out_cc, ref_cc)
    print("KERNEL_OK")
</pallas_src>

<mosaic_0001>
module attributes {stable_mosaic.version = 11 : i64} {
  func.func @_event_reduce_kernel(%arg0: i32, %arg1: i32, %arg2: memref<2x1024xf32, #tpu.memory_space<vmem>>, %arg3: memref<8x2xf32, #tpu.memory_space<vmem>>, %arg4: memref<1x8x1xf32, #tpu.memory_space<vmem>>, %arg5: memref<1x8x1xf32, #tpu.memory_space<vmem>>, %arg6: memref<8x256xf32, #tpu.memory_space<vmem>>, %arg7: memref<8x256xf32, #tpu.memory_space<vmem>>) attributes {dimension_semantics = [#tpu.dimension_semantics<parallel>, #tpu.dimension_semantics<arbitrary>], iteration_bounds = array<i64: 2, 2>, scalar_prefetch = 0 : i64, scratch_operands = 2 : i64, tpu.core_type = #tpu.core_type<tc>, window_params = [{transform_indices = @transform_0, window_bounds = array<i64: 2, 1024>}, {pipeline_mode = #tpu.pipeline_mode<synchronous>, transform_indices = @transform_1, window_bounds = array<i64: 8, 2>}, {transform_indices = @transform_2, window_bounds = array<i64: 1, 8, 1>}, {transform_indices = @transform_3, window_bounds = array<i64: 1, 8, 1>}]} {
    %c0_i32 = arith.constant 0 : i32
    %0 = arith.cmpi eq, %arg1, %c0_i32 : i32
    %1 = arith.extui %0 : i1 to i32
    %c0_i32_0 = arith.constant 0 : i32
    %2 = arith.cmpi ne, %1, %c0_i32_0 : i32
    scf.if %2 {
      %cst_40 = arith.constant 0.000000e+00 : f32
      %136 = vector.broadcast %cst_40 : f32 to vector<8x256xf32>
      %c0_41 = arith.constant 0 : index
      %c0_42 = arith.constant 0 : index
      %137 = vector.load %arg6[%c0_41, %c0_42] : memref<8x256xf32, #tpu.memory_space<vmem>>, vector<8x256xf32>
      tpu.vector_store %arg6[%c0_41, %c0_42], %136 {strides = array<i32>} : memref<8x256xf32, #tpu.memory_space<vmem>>, vector<8x256xf32>,
      %cst_43 = arith.constant 0.000000e+00 : f32
      %138 = vector.broadcast %cst_43 : f32 to vector<8x256xf32>
      %c0_44 = arith.constant 0 : index
      %c0_45 = arith.constant 0 : index
      %139 = vector.load %arg7[%c0_44, %c0_45] : memref<8x256xf32, #tpu.memory_space<vmem>>, vector<8x256xf32>
      tpu.vector_store %arg7[%c0_44, %c0_45], %138 {strides = array<i32>} : memref<8x256xf32, #tpu.memory_space<vmem>>, vector<8x256xf32>,
    } else {
    }
    %c0 = arith.constant 0 : index
    %c0_1 = arith.constant 0 : index
    %3 = vector.load %arg3[%c0, %c0_1] : memref<8x2xf32, #tpu.memory_space<vmem>>, vector<8x2xf32>
    %4 = vector.extract_strided_slice %3 {offsets = [0, 1], sizes = [8, 1], strides = [1, 1]} : vector<8x2xf32> to vector<8x1xf32>
    %5 = vector.extract_strided_slice %3 {offsets = [0, 0], sizes = [8, 1], strides = [1, 1]} : vector<8x2xf32> to vector<8x1xf32>
    %cst = arith.constant 0.000000e+00 : f32
    %6 = vector.broadcast %cst : f32 to vector<8x256xf32>
    %c0_i32_2 = arith.constant 0 : i32
    %c256_i32 = arith.constant 256 : i32
    %7 = arith.muli %c0_i32_2, %c256_i32 : i32
    %8 = tpu.assume_multiple %7, 256 : i32
    %c0_3 = arith.constant 0 : index
    %9 = arith.index_cast %8 : i32 to index
    %10 = vector.load %arg2[%c0_3, %9] : memref<2x1024xf32, #tpu.memory_space<vmem>>, vector<2x256xf32>
    %11 = vector.extract_strided_slice %10 {offsets = [0, 0], sizes = [1, 256], strides = [1, 1]} : vector<2x256xf32> to vector<1x256xf32>
    %12 = vector.extract_strided_slice %10 {offsets = [1, 0], sizes = [1, 256], strides = [1, 1]} : vector<2x256xf32> to vector<1x256xf32>
    %13 = vector.broadcast %11 : vector<1x256xf32> to vector<8x256xf32>
    %14 = vector.broadcast %4 : vector<8x1xf32> to vector<8x256xf32>
    %15 = arith.subf %13, %14 : vector<8x256xf32>
    %16 = vector.broadcast %12 : vector<1x256xf32> to vector<8x256xf32>
    %17 = vector.broadcast %5 : vector<8x1xf32> to vector<8x256xf32>
    %18 = arith.subf %16, %17 : vector<8x256xf32>
    %19 = arith.mulf %15, %15 : vector<8x256xf32>
    %20 = arith.mulf %18, %18 : vector<8x256xf32>
    %21 = arith.addf %19, %20 : vector<8x256xf32>
    %cst_4 = arith.constant 1.000000e+02 : f32
    %22 = vector.broadcast %cst_4 : f32 to vector<8x256xf32>
    %23 = arith.cmpf ogt, %21, %22 : vector<8x256xf32>
    %cst_5 = arith.constant 1.000000e+00 : f32
    %24 = vector.broadcast %cst_5 : f32 to vector<8x256xf32>
    %25 = arith.maximumf %21, %24 : vector<8x256xf32>
    %26 = math.rsqrt %25 : vector<8x256xf32>
    %cst_6 = arith.constant 2.500000e+01 : f32
    %27 = vector.broadcast %cst_6 : f32 to vector<8x256xf32>
    %28 = arith.mulf %27, %26 : vector<8x256xf32>
    %cst_7 = arith.constant 2.000000e+00 : f32
    %29 = vector.broadcast %cst_7 : f32 to vector<8x256xf32>
    %30 = arith.subf %29, %28 : vector<8x256xf32>
    %cst_8 = arith.constant 0.000000e+00 : f32
    %31 = vector.broadcast %cst_8 : f32 to vector<8x256xf32>
    %32 = arith.select %23, %31, %30 : vector<8x256xi1>, vector<8x256xf32>
    %33 = arith.mulf %15, %32 : vector<8x256xf32>
    %34 = arith.addf %6, %33 : vector<8x256xf32>
    %35 = arith.mulf %18, %32 : vector<8x256xf32>
    %36 = arith.addf %6, %35 : vector<8x256xf32>
    %c1_i32 = arith.constant 1 : i32
    %c256_i32_9 = arith.constant 256 : i32
    %37 = arith.muli %c1_i32, %c256_i32_9 : i32
    %38 = tpu.assume_multiple %37, 256 : i32
    %c0_10 = arith.constant 0 : index
    %39 = arith.index_cast %38 : i32 to index
    %40 = vector.load %arg2[%c0_10, %39] : memref<2x1024xf32, #tpu.memory_space<vmem>>, vector<2x256xf32>
    %41 = vector.extract_strided_slice %40 {offsets = [0, 0], sizes = [1, 256], strides = [1, 1]} : vector<2x256xf32> to vector<1x256xf32>
    %42 = vector.extract_strided_slice %40 {offsets = [1, 0], sizes = [1, 256], strides = [1, 1]} : vector<2x256xf32> to vector<1x256xf32>
    %43 = vector.broadcast %41 : vector<1x256xf32> to vector<8x256xf32>
    %44 = vector.broadcast %4 : vector<8x1xf32> to vector<8x256xf32>
    %45 = arith.subf %43, %44 : vector<8x256xf32>
    %46 = vector.broadcast %42 : vector<1x256xf32> to vector<8x256xf32>
    %47 = vector.broadcast %5 : vector<8x1xf32> to vector<8x256xf32>
    %48 = arith.subf %46, %47 : vector<8x256xf32>
    %49 = arith.mulf %45, %45 : vector<8x256xf32>
    %50 = arith.mulf %48, %48 : vector<8x256xf32>
    %51 = arith.addf %49, %50 : vector<8x256xf32>
    %cst_11 = arith.constant 1.000000e+02 : f32
    %52 = vector.broadcast %cst_11 : f32 to vector<8x256xf32>
    %53 = arith.cmpf ogt, %51, %52 : vector<8x256xf32>
    %cst_12 = arith.constant 1.000000e+00 : f32
    %54 = vector.broadcast %cst_12 : f32 to vector<8x256xf32>
    %55 = arith.maximumf %51, %54 : vector<8x256xf32>
    %56 = math.rsqrt %55 : vector<8x256xf32>
    %cst_13 = arith.constant 2.500000e+01 : f32
    %57 = vector.broadcast %cst_13 : f32 to vector<8x256xf32>
    %58 = arith.mulf %57, %56 : vector<8x256xf32>
    %cst_14 = arith.constant 2.000000e+00 : f32
    %59 = vector.broadcast %cst_14 : f32 to vector<8x256xf32>
    %60 = arith.subf %59, %58 : vector<8x256xf32>
    %cst_15 = arith.constant 0.000000e+00 : f32
    %61 = vector.broadcast %cst_15 : f32 to vector<8x256xf32>
    %62 = arith.select %53, %61, %60 : vector<8x256xi1>, vector<8x256xf32>
    %63 = arith.mulf %45, %62 : vector<8x256xf32>
    %64 = arith.addf %34, %63 : vector<8x256xf32>
    %65 = arith.mulf %48, %62 : vector<8x256xf32>
    %66 = arith.addf %36, %65 : vector<8x256xf32>
    %c2_i32 = arith.constant 2 : i32
    %c256_i32_16 = arith.constant 256 : i32
    %67 = arith.muli %c2_i32, %c256_i32_16 : i32
    %68 = tpu.assume_multiple %67, 256 : i32
    %c0_17 = arith.constant 0 : index
    %69 = arith.index_cast %68 : i32 to index
    %70 = vector.load %arg2[%c0_17, %69] : memref<2x1024xf32, #tpu.memory_space<vmem>>, vector<2x256xf32>
    %71 = vector.extract_strided_slice %70 {offsets = [0, 0], sizes = [1, 256], strides = [1, 1]} : vector<2x256xf32> to vector<1x256xf32>
    %72 = vector.extract_strided_slice %70 {offsets = [1, 0], sizes = [1, 256], strides = [1, 1]} : vector<2x256xf32> to vector<1x256xf32>
    %73 = vector.broadcast %71 : vector<1x256xf32> to vector<8x256xf32>
    %74 = vector.broadcast %4 : vector<8x1xf32> to vector<8x256xf32>
    %75 = arith.subf %73, %74 : vector<8x256xf32>
    %76 = vector.broadcast %72 : vector<1x256xf32> to vector<8x256xf32>
    %77 = vector.broadcast %5 : vector<8x1xf32> to vector<8x256xf32>
    %78 = arith.subf %76, %77 : vector<8x256xf32>
    %79 = arith.mulf %75, %75 : vector<8x256xf32>
    %80 = arith.mulf %78, %78 : vector<8x256xf32>
    %81 = arith.addf %79, %80 : vector<8x256xf32>
    %cst_18 = arith.constant 1.000000e+02 : f32
    %82 = vector.broadcast %cst_18 : f32 to vector<8x256xf32>
    %83 = arith.cmpf ogt, %81, %82 : vector<8x256xf32>
    %cst_19 = arith.constant 1.000000e+00 : f32
    %84 = vector.broadcast %cst_19 : f32 to vector<8x256xf32>
    %85 = arith.maximumf %81, %84 : vector<8x256xf32>
    %86 = math.rsqrt %85 : vector<8x256xf32>
    %cst_20 = arith.constant 2.500000e+01 : f32
    %87 = vector.broadcast %cst_20 : f32 to vector<8x256xf32>
    %88 = arith.mulf %87, %86 : vector<8x256xf32>
    %cst_21 = arith.constant 2.000000e+00 : f32
    %89 = vector.broadcast %cst_21 : f32 to vector<8x256xf32>
    %90 = arith.subf %89, %88 : vector<8x256xf32>
    %cst_22 = arith.constant 0.000000e+00 : f32
    %91 = vector.broadcast %cst_22 : f32 to vector<8x256xf32>
    %92 = arith.select %83, %91, %90 : vector<8x256xi1>, vector<8x256xf32>
    %93 = arith.mulf %75, %92 : vector<8x256xf32>
    %94 = arith.addf %64, %93 : vector<8x256xf32>
    %95 = arith.mulf %78, %92 : vector<8x256xf32>
    %96 = arith.addf %66, %95 : vector<8x256xf32>
    %c3_i32 = arith.constant 3 : i32
    %c256_i32_23 = arith.constant 256 : i32
    %97 = arith.muli %c3_i32, %c256_i32_23 : i32
    %98 = tpu.assume_multiple %97, 256 : i32
    %c0_24 = arith.constant 0 : index
    %99 = arith.index_cast %98 : i32 to index
    %100 = vector.load %arg2[%c0_24, %99] : memref<2x1024xf32, #tpu.memory_space<vmem>>, vector<2x256xf32>
    %101 = vector.extract_strided_slice %100 {offsets = [0, 0], sizes = [1, 256], strides = [1, 1]} : vector<2x256xf32> to vector<1x256xf32>
    %102 = vector.extract_strided_slice %100 {offsets = [1, 0], sizes = [1, 256], strides = [1, 1]} : vector<2x256xf32> to vector<1x256xf32>
    %103 = vector.broadcast %101 : vector<1x256xf32> to vector<8x256xf32>
    %104 = vector.broadcast %4 : vector<8x1xf32> to vector<8x256xf32>
    %105 = arith.subf %103, %104 : vector<8x256xf32>
    %106 = vector.broadcast %102 : vector<1x256xf32> to vector<8x256xf32>
    %107 = vector.broadcast %5 : vector<8x1xf32> to vector<8x256xf32>
    %108 = arith.subf %106, %107 : vector<8x256xf32>
    %109 = arith.mulf %105, %105 : vector<8x256xf32>
    %110 = arith.mulf %108, %108 : vector<8x256xf32>
    %111 = arith.addf %109, %110 : vector<8x256xf32>
    %cst_25 = arith.constant 1.000000e+02 : f32
    %112 = vector.broadcast %cst_25 : f32 to vector<8x256xf32>
    %113 = arith.cmpf ogt, %111, %112 : vector<8x256xf32>
    %cst_26 = arith.constant 1.000000e+00 : f32
    %114 = vector.broadcast %cst_26 : f32 to vector<8x256xf32>
    %115 = arith.maximumf %111, %114 : vector<8x256xf32>
    %116 = math.rsqrt %115 : vector<8x256xf32>
    %cst_27 = arith.constant 2.500000e+01 : f32
    %117 = vector.broadcast %cst_27 : f32 to vector<8x256xf32>
    %118 = arith.mulf %117, %116 : vector<8x256xf32>
    %cst_28 = arith.constant 2.000000e+00 : f32
    %119 = vector.broadcast %cst_28 : f32 to vector<8x256xf32>
    %120 = arith.subf %119, %118 : vector<8x256xf32>
    %cst_29 = arith.constant 0.000000e+00 : f32
    %121 = vector.broadcast %cst_29 : f32 to vector<8x256xf32>
    %122 = arith.select %113, %121, %120 : vector<8x256xi1>, vector<8x256xf32>
    %123 = arith.mulf %105, %122 : vector<8x256xf32>
    %124 = arith.addf %94, %123 : vector<8x256xf32>
    %125 = arith.mulf %108, %122 : vector<8x256xf32>
    %126 = arith.addf %96, %125 : vector<8x256xf32>
    %c4_i32 = arith.constant 4 : i32
    %c0_30 = arith.constant 0 : index
    %c0_31 = arith.constant 0 : index
    %127 = vector.load %arg6[%c0_30, %c0_31] : memref<8x256xf32, #tpu.memory_space<vmem>>, vector<8x256xf32>
    %128 = arith.addf %127, %124 : vector<8x256xf32>
    %c0_32 = arith.constant 0 : index
    %c0_33 = arith.constant 0 : index
    %129 = vector.load %arg6[%c0_32, %c0_33] : memref<8x256xf32, #tpu.memory_space<vmem>>, vector<8x256xf32>
    tpu.vector_store %arg6[%c0_32, %c0_33], %128 {strides = array<i32>} : memref<8x256xf32, #tpu.memory_space<vmem>>, vector<8x256xf32>,
    %c0_34 = arith.constant 0 : index
    %c0_35 = arith.constant 0 : index
    %130 = vector.load %arg7[%c0_34, %c0_35] : memref<8x256xf32, #tpu.memory_space<vmem>>, vector<8x256xf32>
    %131 = arith.addf %130, %126 : vector<8x256xf32>
    %c0_36 = arith.constant 0 : index
    %c0_37 = arith.constant 0 : index
    %132 = vector.load %arg7[%c0_36, %c0_37] : memref<8x256xf32, #tpu.memory_space<vmem>>, vector<8x256xf32>
    tpu.vector_store %arg7[%c0_36, %c0_37], %131 {strides = array<i32>} : memref<8x256xf32, #tpu.memory_space<vmem>>, vector<8x256xf32>,
    %c1_i32_38 = arith.constant 1 : i32
    %133 = arith.cmpi eq, %arg1, %c1_i32_38 : i32
    %134 = arith.extui %133 : i1 to i32
    %c0_i32_39 = arith.constant 0 : i32
    %135 = arith.cmpi ne, %134, %c0_i32_39 : i32
    scf.if %135 {
      %c0_40 = arith.constant 0 : index
      %c0_41 = arith.constant 0 : index
      %136 = vector.load %arg6[%c0_40, %c0_41] : memref<8x256xf32, #tpu.memory_space<vmem>>, vector<8x256xf32>
      %cst_42 = arith.constant dense<0.000000e+00> : vector<8xf32>
      %137 = vector.multi_reduction <add>, %136, %cst_42 [1] : vector<8x256xf32> to vector<8xf32>
      %138 = vector.shape_cast %137 : vector<8xf32> to vector<8x1xf32>
      %c0_43 = arith.constant 0 : index
      %c0_44 = arith.constant 0 : index
      %c0_45 = arith.constant 0 : index
      %139 = vector.load %arg4[%c0_43, %c0_44, %c0_45] : memref<1x8x1xf32, #tpu.memory_space<vmem>>, vector<1x8x1xf32>
      %140 = vector.shape_cast %139 : vector<1x8x1xf32> to vector<8x1xf32>
      %141 = vector.shape_cast %138 : vector<8x1xf32> to vector<1x8x1xf32>
      tpu.vector_store %arg4[%c0_43, %c0_44, %c0_45], %141 {strides = array<i32>} : memref<1x8x1xf32, #tpu.memory_space<vmem>>, vector<1x8x1xf32>,
      %c0_46 = arith.constant 0 : index
      %c0_47 = arith.constant 0 : index
      %142 = vector.load %arg7[%c0_46, %c0_47] : memref<8x256xf32, #tpu.memory_space<vmem>>, vector<8x256xf32>
      %cst_48 = arith.constant dense<0.000000e+00> : vector<8xf32>
      %143 = vector.multi_reduction <add>, %142, %cst_48 [1] : vector<8x256xf32> to vector<8xf32>
      %144 = vector.shape_cast %143 : vector<8xf32> to vector<8x1xf32>
      %c0_49 = arith.constant 0 : index
      %c0_50 = arith.constant 0 : index
      %c0_51 = arith.constant 0 : index
      %145 = vector.load %arg5[%c0_49, %c0_50, %c0_51] : memref<1x8x1xf32, #tpu.memory_space<vmem>>, vector<1x8x1xf32>
      %146 = vector.shape_cast %145 : vector<1x8x1xf32> to vector<8x1xf32>
      %147 = vector.shape_cast %144 : vector<8x1xf32> to vector<1x8x1xf32>
      tpu.vector_store %arg5[%c0_49, %c0_50, %c0_51], %147 {strides = array<i32>} : memref<1x8x1xf32, #tpu.memory_space<vmem>>, vector<1x8x1xf32>,
    } else {
    }
    return
  }
  func.func @transform_0(%arg0: i32, %arg1: i32) -> (i32, i32) {
    %c2_i32 = arith.constant 2 : i32
    %0 = arith.muli %arg0, %c2_i32 : i32
    %1 = arith.addi %0, %arg1 : i32
    %c0_i32 = arith.constant 0 : i32
    %c0_i32_0 = arith.constant 0 : i32
    return %c0_i32, %1 : i32, i32
  }
  func.func @transform_1(%arg0: i32, %arg1: i32) -> (i32, i32) {
    %c0_i32 = arith.constant 0 : i32
    %c0_i32_0 = arith.constant 0 : i32
    %c0_i32_1 = arith.constant 0 : i32
    return %c0_i32, %c0_i32_0 : i32, i32
  }
  func.func @transform_2(%arg0: i32, %arg1: i32) -> (i32, i32, i32) {
    %c0_i32 = arith.constant 0 : i32
    %c0_i32_0 = arith.constant 0 : i32
    %c0_i32_1 = arith.constant 0 : i32
    return %arg0, %c0_i32, %c0_i32_0 : i32, i32, i32
  }
  func.func @transform_3(%arg0: i32, %arg1: i32) -> (i32, i32, i32) {
    %c0_i32 = arith.constant 0 : i32
    %c0_i32_0 = arith.constant 0 : i32
    %c0_i32_1 = arith.constant 0 : i32
    return %arg0, %c0_i32, %c0_i32_0 : i32, i32, i32
  }
}

</mosaic_0001>

<bundles_post_ra>
// kernel: tpu_custom_call.1
= control target key start
LH: loop header
LB: loop body
LE: loop exit
PB: predicated region body
PF: predicated region fallthrough
CT: control target
= control target key end

     0   :  { %9 = vsyncpa [#allocation5], 0  ;;  %s1222_s0 = inlined_call_operand.hbm [shape: f32[2,4096], index: 0, kind: input, shape index: {}]   ;;  %s1223_s1 = inlined_call_operand.vmem [shape: f32[8,2], index: 1, kind: input, shape index: {}]   ;;  %s1224_s2 = inlined_call_operand.vmem [shape: f32[2,8,1], index: 2, kind: output, shape index: {0}]   ;;  %s1225_s3 = inlined_call_operand.vmem [shape: f32[2,8,1], index: 3, kind: output, shape index: {1}]  }
   0x1   :  { %11 = vsyncpa [#allocation5 + $0x1], 0  ;;  %s863_s12 = smov 0   ;;  %s865_s13 = smov 0  }
   0x2   :  { %s867_s14 = smov 0   ;;  %s869_s15 = smov 0  }
   0x3   :  { %s871_s16 = smov 0   ;;  %s873_s17 = smov 0  }
   0x4   :  { %s875_s18 = smov 0   ;;  %s877_s19 = smov 0  }
   0x5 LB: > { %s628_s20 = sadd.s32 4294967295, %s838_s19   ;;  %s26_s21 = sadd.s32 1, %s830_s17  ;;  %s838_s19 = sphi %s877_s19, %s17_s19   ;;  %s834_s18 = sphi %s875_s18, %s1236_s18   ;;  %s830_s17 = sphi %s873_s17, %s1235_s17   ;;  %s826_s16 = sphi %s871_s16, %s1234_s16   ;;  %s822_s15 = sphi %s869_s15, %s1233_s15   ;;  %s818_s14 = sphi %s867_s14, %s1232_s14   ;;  %s814_s13 = sphi %s865_s13, %s1231_s13   ;;  %s810_s12 = sphi %s863_s12, %s1230_s12  }
   0x6   : > { %p27_p0 = scmp.ge.s32.totalorder %s26_s21, 2  ;;  %s29_s22 = sadd.s32 1, %s834_s18 }
   0x7   : > { %s630_s23 = sshll.u32 %s834_s18, 1  ;;  %s40_s24 = sadd.s32 1, %s818_s14 }
   0x8   : > { %s1238_s21 = smov (%p27_p0, %s26_s21), 0  ;;  %s1240_s22 = smov (!%p27_p0, %s29_s22), %s834_s18 }
   0x9   : > { %s34_s25 = sadd.s32 %s830_s17, %s630_s23  ;;  %p47_p1 = scmp.ne.s32.totalorder %s818_s14, %s814_s13 }
   0xa   : > { %p31_p2 = scmp.ge.s32.totalorder %s1240_s22, 2  ;;  %p48_p3 = scmp.eq.s32.totalorder %s838_s19, 0 }
   0xb   : > { %p53_p4 = scmp.ne.s32.totalorder %s814_s13, %s810_s12  ;;  %p54_p5 = scmp.eq.s32.totalorder %s628_s20, 0 }
   0xc   : > { %s1242_s22 = smov (%p31_p2, %s1240_s22), 0  ;;  %p916_p6 = por %p48_p3, %p47_p1 }
   0xd   : > { %p920_p7 = por %p54_p5, %p53_p4  ;;  %s631_s28 = sshll.u32 %s1242_s22, 1 }
   0xe   : > { %s36_s29 = sadd.s32 %s631_s28, %s1238_s21  ;;  %p656_p8 = scmp.lt.s32.totalorder %s838_s19, 4 }
   0xf   : > { %s37_s30 = ssub.s32 %s34_s25, %s36_s29  ;;  %s153_s4 = sand.u32 1, %s818_s14  }
  0x10   : > { %p38_p9 = scmp.eq.s32.totalorder %s37_s30, 0  ;;  %s634_s5 = sshll.u32 %s153_s4, 4 }
  0x11   : > { %s649_s6 = sshll.u32 %s34_s25, 4  ;;  %s157_s12 = scalar_lea.vmem [#allocation4], %s634_s5 }
  0x12   : > { %s929_s7 = scalar_select %p38_p9, %s818_s14, %s40_s24  }
  0x13   : > { %s164_s10 = scalar_lea.hbm %s1222_s0, %s649_s6  ;;  %s168_s20 = sshll.u32 %s157_s12, 4  ;;  %s169_s20 = int_to_ptr.vmem [resolvable:$true] %s168_s20 }
  0x14   : > { %s166_s11 = sshll.u32 %s164_s10, 4  ;;  %p653_p10 = pnand %p656_p8, %p916_p6  ;;  %s167_s11 = int_to_ptr.hbm [resolvable:$true] %s166_s11 }
  0x15   : > { %p638_p11 = scmp.ge.s32.totalorder %s838_s19, 1  ;;  %p173_p12 = scmp.lt.s32.totalorder %s838_s19, 5 }
  0x16   : > { %s154_s23 = scalar_lea.sflag [#allocation5], %s153_s4 }
  0x17   : > { %655 = dma.hbm_to_vmem [thread:$0]  (!%p653_p10), %s167_s11, 256, %s169_s20, %s154_s23  }
  0x18   : > { %p174_p13 = pnand %p638_p11, %p173_p12 }
  0x19   : > { %s179_s24 = sand.u32 (!%p174_p13), 1, %s814_s13  }
  0x1a   : > { %177 = sbr.rel (%p174_p13) target bundleno = 359 (0x167), region = 28  ;;  %s639_s25 = sshll.u32 (!%p174_p13), %s179_s24, 4 }
  0x1b   : > { %s180_s28 = scalar_lea.sflag (!%p174_p13), [#allocation5], %s179_s24  ;;  %s941_s29 = scalar_lea.vmem (!%p174_p13), [#allocation4], %s639_s25 }
  0x1f   : > { %805 = dma.done.wait (%p920_p7), %s180_s28, 256  }
  0x20   : > { %807 = vsyncadd (%p920_p7), %s180_s28, 4294967040  ;;  %p213_p0 = scmp.lt.s32.totalorder %s826_s16, 1  ;;  %p642_p1 = scmp.ne.s32.totalorder %s822_s15, 0 }
  0x22   : > { %s1244_s16 = smov (!%p213_p0, %s826_s16), 1  ;;  %224 = sbr.rel (%p642_p1) target bundleno = 44 (0x2c), region = 36 }
  0x23   : > { %s640_s26 = sshll.u32 %s1244_s16, 3 }
  0x24   : > { %s952_s5 = scalar_lea.vmem %s1224_s2, %s640_s26  ;;  %s957_s9 = scalar_lea.vmem %s1225_s3, %s640_s26 }
  0x27   : > { %v840_v0 = vmov 0.0  }
  0x28   : > { %225 = vst [vmem:[#allocation2] sm:$0xff] %v840_v0 }
  0x29   : > { %226 = vst [vmem:[#allocation2 + $0x8] sm:$0xff] %v840_v0 }
  0x2a   : > { %227 = vst [vmem:[#allocation3 + $0x8] sm:$0xff] %v840_v0 }
  0x2b   : > { %228 = vst [vmem:[#allocation3] sm:$0xff] %v840_v0 }
  0x2c PF: > { %v229_v1 = vld [vmem:[%s1223_s1] sm:$0xff]  ;;  %v841_v2 = vmov 1   ;;  %v842_v3 = vmov 0   ;;  %v644_v6 = vld [vmem:[%s941_s29 + $0x8] sm:$0xf]  ;;  %p646_p2 = scmp.ne.s32.totalorder %s822_s15, 1 }
  0x2d   : > { %724 = vset.pattern.permute.xlu0 %v841_v2  ;;  %v230_v4 = vld [vmem:[%s941_s29] sm:$0xf]  ;;  %v643_v5 = vld [vmem:[%s941_s29 + $0x4] sm:$0xf]  ;;  %v367_v11 = vperm.slane %v644_v6, 0  ;;  %v368_v14 = vperm.slane %v644_v6, 2 }
  0x2e   : > { %240 = vperm.xlu0 %724, %v229_v1   ;;  %v232_v7 = vperm.slane %v230_v4, 0  ;;  %v233_v8 = vperm.slane %v230_v4, 2  ;;  %v304_v9 = vperm.slane %v643_v5, 0  ;;  %v305_v10 = vperm.slane %v643_v5, 2  ;;  %v645_v12 = vld [vmem:[%s941_s29 + $0xc] sm:$0xf] }
  0x2f   : > { %v430_v15 = vperm.slane %v645_v12, 0  ;;  %v431_v16 = vperm.slane %v645_v12, 2  ;;  %v371_v21 = vperm.slane %v367_v11, 0  ;;  %v245_v22 = vperm.slane %v230_v4, 1 }
  0x30   : > { %v236_v13 = vperm.slane %v232_v7, 0  ;;  %v237_v18 = vperm.slane %v233_v8, 0  ;;  %v308_v19 = vperm.slane %v304_v9, 0  ;;  %v309_v20 = vperm.slane %v305_v10, 0 }
  0x31   : > { %v246_v23 = vperm.slane %v230_v4, 3  ;;  %v312_v24 = vperm.slane %v643_v5, 1  ;;  %v313_v25 = vperm.slane %v643_v5, 3  ;;  %v375_v26 = vperm.slane %v644_v6, 1 }
  0x32   : > { %v376_v27 = vperm.slane %v644_v6, 3  ;;  %v438_v28 = vperm.slane %v645_v12, 1  ;;  %v439_v29 = vperm.slane %v645_v12, 3  ;;  %v372_v30 = vperm.slane %v368_v14, 0 }
  0x33   : > { %v434_v31 = vperm.slane %v430_v15, 0  ;;  %v435_v32 = vperm.slane %v431_v16, 0  ;;  %v249_v38 = vperm.slane %v245_v22, 1  ;;  %v250_v39 = vperm.slane %v246_v23, 1 }
  0x34   : > { %v316_v40 = vperm.slane %v312_v24, 1  ;;  %v317_v41 = vperm.slane %v313_v25, 1  ;;  %v379_v42 = vperm.slane %v375_v26, 1  ;;  %v380_v43 = vperm.slane %v376_v27, 1 }
  0x35   : > { %v442_v44 = vperm.slane %v438_v28, 1  ;;  %v443_v45 = vperm.slane %v439_v29, 1 }
  0x36   : > { %725 = vset.pattern.permute.xlu0 %v842_v3 }
  0x37   : > { %252 = vperm.xlu0 %725, %v229_v1  }
  0xa0   : > { %v241_v17 = vpop.permute.xlu0 %240 }
  0xa1   : > { %v967_v33 = vsub.f32 %v236_v13, %v241_v17  ;;  %v969_v34 = vsub.f32 %v237_v18, %v241_v17  ;;  %v971_v35 = vsub.f32 %v308_v19, %v241_v17  ;;  %v973_v36 = vsub.f32 %v309_v20, %v241_v17 }
  0xa2   : > { %v975_v37 = vsub.f32 %v371_v21, %v241_v17  ;;  %v977_v46 = vsub.f32 %v372_v30, %v241_v17  ;;  %v979_v47 = vsub.f32 %v434_v31, %v241_v17  ;;  %v981_v48 = vsub.f32 %v435_v32, %v241_v17 }
  0xa3   : > { %v257_v49 = vmul.f32 %v967_v33, %v967_v33  ;;  %v258_v50 = vmul.f32 %v969_v34, %v969_v34  ;;  %v320_v51 = vmul.f32 %v971_v35, %v971_v35  ;;  %v321_v52 = vmul.f32 %v973_v36, %v973_v36 }
  0xa4   : > { %v383_v53 = vmul.f32 %v975_v37, %v975_v37  ;;  %v384_v3 = vmul.f32 %v977_v46, %v977_v46  ;;  %v446_v11 = vmul.f32 %v979_v47, %v979_v47  ;;  %v447_v20 = vmul.f32 %v981_v48, %v981_v48 }
  0xa9   : > { %v253_v54 = vpop.permute.xlu0 %252 }
  0xaa   : > { %v993_v55 = vsub.f32 %v249_v38, %v253_v54  ;;  %v995_v56 = vsub.f32 %v250_v39, %v253_v54  ;;  %v997_v57 = vsub.f32 %v316_v40, %v253_v54  ;;  %v999_v58 = vsub.f32 %v317_v41, %v253_v54 }
  0xab   : > { %v1001_v59 = vsub.f32 %v379_v42, %v253_v54  ;;  %v1003_v60 = vsub.f32 %v380_v43, %v253_v54  ;;  %v1005_v61 = vsub.f32 %v442_v44, %v253_v54  ;;  %v1007_v62 = vsub.f32 %v443_v45, %v253_v54 }
  0xac   : > { %v259_v63 = vmul.f32 %v993_v55, %v993_v55  ;;  %v260_v0 = vmul.f32 %v995_v56, %v995_v56  ;;  %v322_v1 = vmul.f32 %v997_v57, %v997_v57  ;;  %v323_v2 = vmul.f32 %v999_v58, %v999_v58 }
  0xad   : > { %v385_v4 = vmul.f32 %v1001_v59, %v1001_v59  ;;  %v386_v5 = vmul.f32 %v1003_v60, %v1003_v60  ;;  %v448_v6 = vmul.f32 %v1005_v61, %v1005_v61  ;;  %v449_v12 = vmul.f32 %v1007_v62, %v1007_v62 }
  0xae   : > { %v1025_v7 = vadd.f32 %v259_v63, %v257_v49  ;;  %v1027_v8 = vadd.f32 %v260_v0, %v258_v50  ;;  %v1029_v9 = vadd.f32 %v322_v1, %v320_v51  ;;  %v1031_v10 = vadd.f32 %v323_v2, %v321_v52 }
  0xaf   : > { %v1043_v15 = vadd.f32 %v385_v4, %v383_v53  ;;  %v1045_v16 = vadd.f32 %v386_v5, %v384_v3  ;;  %v1053_v19 = vadd.f32 %v448_v6, %v446_v11  ;;  %v1066_v23 = vadd.f32 %v449_v12, %v447_v20 }
  0xb0   : > { %v1038_v13 = vmax.f32 %v1025_v7, 1.0  ;;  %v1041_v14 = vmax.f32 %v1027_v8, 1.0  ;;  %v1048_v17 = vmax.f32 %v1029_v9, 1.0  ;;  %v1051_v18 = vmax.f32 %v1031_v10, 1.0 }
  0xb1   : > { %v1061_v21 = vmax.f32 %v1043_v15, 1.0  ;;  %v1064_v22 = vmax.f32 %v1045_v16, 1.0  ;;  %v1070_v24 = vmax.f32 %v1053_v19, 1.0  ;;  %v1075_v26 = vmax.f32 %v1066_v23, 1.0 }
  0xb2   : > { %726 = vrsqrt.f32 %v1038_v13  ;;  %vm273_vm0 = vweird.f32 %v1038_v13  ;;  %vm283_vm1 = vweird.f32 %v1041_v14  ;;  %vm336_vm3 = vweird.f32 %v1048_v17 }
  0xb3   : > { %728 = vrsqrt.f32 %v1041_v14  ;;  %vm346_vm5 = vweird.f32 %v1051_v18  ;;  %vm399_vm7 = vweird.f32 %v1061_v21  ;;  %vm263_vm9 = vcmp.gt.f32.partialorder %v1025_v7, 100.0 }
  0xb4   : > { %730 = vrsqrt.f32 %v1048_v17  ;;  %vm264_vm11 = vcmp.gt.f32.partialorder %v1027_v8, 100.0  ;;  %vm326_vm12 = vcmp.gt.f32.partialorder %v1029_v9, 100.0 }
  0xb5   : > { %732 = vrsqrt.f32 %v1051_v18 }
  0xb6   : > { %734 = vrsqrt.f32 %v1061_v21 }
  0xb7   : > { %736 = vrsqrt.f32 %v1064_v22 }
  0xb8   : > { %v727_v25 = vpop.eup %726  ;;  %738 = vrsqrt.f32 %v1070_v24 }
  0xb9   : > { %v729_v27 = vpop.eup %728  ;;  %v268_v28 = vmul.f32 %v727_v25, %v1038_v13  ;;  %vm274_vm2 = vweird.f32 %v727_v25  ;;  %740 = vrsqrt.f32 %v1075_v26 }
  0xba   : > { %v1079_v29 = vpop.eup %730  ;;  %v278_v30 = vmul.f32 %v729_v27, %v1041_v14  ;;  %vm284_vm4 = vweird.f32 %v729_v27  ;;  %vm275_vm13 = vmor %vm273_vm0, %vm274_vm2 }
  0xbb   : > { %v1084_v31 = vpop.eup %732  ;;  %v269_v32 = vmul.f32 %v727_v25, %v268_v28  ;;  %v331_v38 = vmul.f32 %v1079_v29, %v1048_v17  ;;  %vm337_vm6 = vweird.f32 %v1079_v29  ;;  %vm285_vm15 = vmor %vm283_vm1, %vm284_vm4 }
  0xbc   : > { %v1089_v39 = vpop.eup %734  ;;  %v279_v40 = vmul.f32 %v729_v27, %v278_v30  ;;  %v341_v41 = vmul.f32 %v1084_v31, %v1051_v18  ;;  %vm347_vm8 = vweird.f32 %v1084_v31  ;;  %vm338_vm0 = vmor %vm336_vm3, %vm337_vm6  ;;  %vm409_vm3 = vweird.f32 %v1064_v22 }
  0xbd   : > { %v1095_v42 = vpop.eup %736  ;;  %v270_v43 = vmul.f32 0.5, %v269_v32  ;;  %v332_v44 = vmul.f32 %v1079_v29, %v331_v38  ;;  %v394_v45 = vmul.f32 %v1089_v39, %v1061_v21  ;;  %vm400_vm10 = vweird.f32 %v1089_v39  ;;  %vm348_vm1 = vmor %vm346_vm5, %vm347_vm8 }
  0xbe   : > { %v1102_v49 = vpop.eup %738  ;;  %v280_v50 = vmul.f32 0.5, %v279_v40  ;;  %v342_v51 = vmul.f32 %v1084_v31, %v341_v41  ;;  %v404_v52 = vmul.f32 %v1095_v42, %v1064_v22  ;;  %vm410_vm14 = vweird.f32 %v1095_v42  ;;  %vm401_vm2 = vmor %vm399_vm7, %vm400_vm10 }
  0xbf   : > { %v271_v53 = vsub.f32 1.5, %v270_v43  ;;  %v333_v54 = vmul.f32 0.5, %v332_v44  ;;  %v395_v63 = vmul.f32 %v1089_v39, %v394_v45  ;;  %v457_v0 = vmul.f32 %v1102_v49, %v1070_v24  ;;  %v1117_v12 = vpop.eup %740  ;;  %vm1150_vm4 = vmor %vm409_vm3, %vm410_vm14 }
  0xc0   : > { %v281_v1 = vsub.f32 1.5, %v280_v50  ;;  %v343_v2 = vmul.f32 0.5, %v342_v51  ;;  %v405_v3 = vmul.f32 %v1095_v42, %v404_v52  ;;  %vm463_vm5 = vweird.f32 %v1102_v49 }
  0xc1   : > { %v272_v4 = vmul.f32 %v727_v25, %v271_v53  ;;  %v334_v5 = vsub.f32 1.5, %v333_v54  ;;  %v396_v6 = vmul.f32 0.5, %v395_v63  ;;  %v458_v11 = vmul.f32 %v1102_v49, %v457_v0 }
  0xc2   : > { %v282_v20 = vmul.f32 %v729_v27, %v281_v1  ;;  %v344_v28 = vsub.f32 1.5, %v343_v2  ;;  %v406_v30 = vmul.f32 0.5, %v405_v3  ;;  %v467_v7 = vmul.f32 %v1117_v12, %v1075_v26 }
  0xc3   : > { %v276_v32 = vsel %vm275_vm13, %v727_v25, %v272_v4  ;;  %v335_v38 = vmul.f32 %v1079_v29, %v334_v5  ;;  %v397_v40 = vsub.f32 1.5, %v396_v6  ;;  %v459_v41 = vmul.f32 0.5, %v458_v11 }
  0xc4   : > { %v286_v43 = vsel %vm285_vm15, %v729_v27, %v282_v20  ;;  %v287_v44 = vmul.f32 25.0, %v276_v32  ;;  %v345_v13 = vmul.f32 %v1084_v31, %v344_v28  ;;  %v407_v45 = vsub.f32 1.5, %v406_v30 }
  0xc5   : > { %v288_v50 = vmul.f32 25.0, %v286_v43  ;;  %v339_v25 = vsel %vm338_vm0, %v1079_v29, %v335_v38  ;;  %v398_v14 = vmul.f32 %v1089_v39, %v397_v40  ;;  %v460_v27 = vsub.f32 1.5, %v459_v41 }
  0xc6   : > { %v289_v51 = vsub.f32 2.0, %v287_v44  ;;  %v349_v52 = vsel %vm348_vm1, %v1084_v31, %v345_v13  ;;  %v350_v53 = vmul.f32 25.0, %v339_v25  ;;  %v408_v17 = vmul.f32 %v1095_v42, %v407_v45 }
  0xc7   : > { %v290_v29 = vsub.f32 2.0, %v288_v50  ;;  %v351_v54 = vmul.f32 25.0, %v349_v52  ;;  %v402_v63 = vsel %vm401_vm2, %v1089_v39, %v398_v14  ;;  %v461_v22 = vmul.f32 %v1102_v49, %v460_v27  ;;  %v490_v50 = vld [vmem:[#allocation2] sm:$0xff] }
  0xc8   : > { %v291_v18 = vsel %vm263_vm9, 0.0, %v289_v51  ;;  %v352_v0 = vsub.f32 2.0, %v350_v53  ;;  %v413_v21 = vmul.f32 25.0, %v402_v63  ;;  %v412_v39 = vsel %vm1150_vm4, %v1095_v42, %v408_v17  ;;  %v491_v63 = vld [vmem:[#allocation2 + $0x8] sm:$0xff] }
  0xc9   : > { %v353_v1 = vsub.f32 2.0, %v351_v54  ;;  %v292_v2 = vsel %vm264_vm11, 0.0, %v290_v29  ;;  %v293_v3 = vmul.f32 %v291_v18, %v967_v33  ;;  %vm462_vm6 = vweird.f32 %v1070_v24 }
  0xca   : > { %v354_v4 = vsel %vm326_vm12, 0.0, %v352_v0  ;;  %v297_v5 = vmul.f32 %v291_v18, %v993_v55  ;;  %v415_v11 = vsub.f32 2.0, %v413_v21  ;;  %vm327_vm7 = vcmp.gt.f32.partialorder %v1031_v10, 100.0  ;;  %vm464_vm8 = vmor %vm462_vm6, %vm463_vm5  ;;  %v497_v18 = vld [vmem:[#allocation3] sm:$0xff] }
  0xcb   : > { %v356_v6 = vmul.f32 %v354_v4, %v971_v35  ;;  %v360_v42 = vmul.f32 %v354_v4, %v997_v57  ;;  %v414_v20 = vmul.f32 25.0, %v412_v39  ;;  %v355_v8 = vsel %vm327_vm7, 0.0, %v353_v1 }
  0xcc   : > { %vm389_vm9 = vcmp.gt.f32.partialorder %v1043_v15, 100.0  ;;  %v465_v33 = vsel %vm464_vm8, %v1102_v49, %v461_v22  ;;  %v468_v9 = vmul.f32 %v1117_v12, %v467_v7  ;;  %v294_v55 = vmul.f32 %v292_v2, %v969_v34 }
  0xcd   : > { %v417_v24 = vsel %vm389_vm9, 0.0, %v415_v11  ;;  %v298_v35 = vmul.f32 %v292_v2, %v995_v56  ;;  %v358_v57 = vadd.f32 %v356_v6, %v293_v3  ;;  %v362_v28 = vadd.f32 %v360_v42, %v297_v5 }
  0xce   : > { %v469_v30 = vmul.f32 0.5, %v468_v9  ;;  %v357_v10 = vmul.f32 %v355_v8, %v973_v36  ;;  %v361_v32 = vmul.f32 %v355_v8, %v999_v58  ;;  %v416_v38 = vsub.f32 2.0, %v414_v20 }
  0xcf   : > { %v476_v40 = vmul.f32 25.0, %v465_v33  ;;  %v419_v15 = vmul.f32 %v417_v24, %v975_v37  ;;  %v423_v49 = vmul.f32 %v417_v24, %v1001_v59  ;;  %vm473_vm10 = vweird.f32 %v1117_v12 }
  0xd0   : > { %v470_v41 = vsub.f32 1.5, %v469_v30  ;;  %vm390_vm11 = vcmp.gt.f32.partialorder %v1045_v16, 100.0  ;;  %vm452_vm12 = vcmp.gt.f32.partialorder %v1053_v19, 100.0  ;;  %vm472_vm13 = vweird.f32 %v1075_v26  ;;  %v496_v19 = vld [vmem:[#allocation3 + $0x8] sm:$0xff] }
  0xd1   : > { %v478_v34 = vsub.f32 2.0, %v476_v40  ;;  %v421_v56 = vadd.f32 %v419_v15, %v358_v57  ;;  %v425_v43 = vadd.f32 %v423_v49, %v362_v28  ;;  %v359_v58 = vadd.f32 %v357_v10, %v294_v55  ;;  %vm474_vm14 = vmor %vm472_vm13, %vm473_vm10 }
  0xd2   : > { %v471_v36 = vmul.f32 %v1117_v12, %v470_v41  ;;  %v418_v44 = vsel %vm390_vm11, 0.0, %v416_v38  ;;  %v363_v13 = vadd.f32 %v361_v32, %v298_v35  ;;  %vm453_vm15 = vcmp.gt.f32.partialorder %v1066_v23, 100.0 }
  0xd3   : > { %v480_v37 = vsel %vm452_vm12, 0.0, %v478_v34  ;;  %v420_v14 = vmul.f32 %v418_v44, %v977_v46  ;;  %v424_v27 = vmul.f32 %v418_v44, %v1003_v60 }
  0xd4   : > { %v475_v59 = vsel %vm474_vm14, %v1117_v12, %v471_v36  ;;  %v482_v45 = vmul.f32 %v480_v37, %v979_v47  ;;  %v486_v16 = vmul.f32 %v480_v37, %v1005_v61 }
  0xd5   : > { %v477_v25 = vmul.f32 25.0, %v475_v59  ;;  %v422_v53 = vadd.f32 %v420_v14, %v359_v58  ;;  %v426_v17 = vadd.f32 %v424_v27, %v363_v13 }
  0xd6   : > { %v484_v51 = vadd.f32 %v482_v45, %v421_v56  ;;  %v488_v26 = vadd.f32 %v486_v16, %v425_v43 }
  0xd7   : > { %v479_v52 = vsub.f32 2.0, %v477_v25 }
  0xd8   : > { %v492_v29 = vadd.f32 %v490_v50, %v484_v51  ;;  %v498_v12 = vadd.f32 %v496_v19, %v488_v26 }
  0xd9   : > { %v481_v54 = vsel %vm453_vm15, 0.0, %v479_v52 }
  0xda   : > { %v483_v47 = vmul.f32 %v481_v54, %v981_v48  ;;  %v487_v61 = vmul.f32 %v481_v54, %v1007_v62  ;;  %494 = vst [vmem:[#allocation2] sm:$0xff] %v492_v29 }
  0xdb   : > { %500 = vst [vmem:[#allocation3 + $0x8] sm:$0xff] %v498_v12 }
  0xdc   : > { %v485_v46 = vadd.f32 %v483_v47, %v422_v53  ;;  %v489_v60 = vadd.f32 %v487_v61, %v426_v17 }
  0xdd   : > { %505 = sbr.rel (%p646_p2) target bundleno = 359 (0x167), region = 40 }
  0xde   : > { %v493_v0 = vadd.f32 %v491_v63, %v485_v46  ;;  %v499_v31 = vadd.f32 %v497_v18, %v489_v60 }
  0xe0   : > { %495 = vst [vmem:[#allocation2 + $0x8] sm:$0xff] %v493_v0 }
  0xe1   : > { %501 = vst [vmem:[#allocation3] sm:$0xff] %v499_v31 }
  0xe2   : > { %v506_v23 = vld [vmem:[#allocation2] sm:$0xff]  ;;  %v513_v62 = vld [vmem:[#allocation3 + $0x8] sm:$0xff]  ;;  %vm511_vm0 = vcmask 7168  }
  0xe7   : > { %v507_v21 = vld [vmem:[#allocation2 + $0x8] sm:$0xff] }
  0xe8   : > { %v508_v48 = vadd.f32 %v507_v21, %v506_v23  ;;  %v514_v1 = vld [vmem:[#allocation3] sm:$0xff] }
  0xe9   : > { %v515_v39 = vadd.f32 %v514_v1, %v513_v62 }
  0xea   : > { %509 = vadd.xlane.f32.xlu0 %v508_v48 }
  0xf2   : > { %516 = vadd.xlane.f32.xlu0 %v515_v39 }
 0x15d   : > { %v510_v22 = vpop.xlane.xlu0 %509 }
 0x15e   : > { %512 = vst.msk [vmem:[%s952_s5] sm:$0xff] %vm511_vm0, %v510_v22 }
 0x165   : > { %v517_v7 = vpop.xlane.xlu0 %516 }
 0x166   : > { %518 = vst.msk [vmem:[%s957_s9] sm:$0xff] %vm511_vm0, %v517_v7 }
 0x167 PF: > { %s17_s19 = sadd.s32 1, %s838_s19   ;;  %s1230_s12 = smov %s814_s13 }
 0x168   : > { %p14_p3 = scmp.ge.s32.totalorder %s17_s19, 6   ;;  %s1231_s13 = smov %s818_s14 }
 0x169   : > { %s1232_s14 = smov %s929_s7  ;;  %s1233_s15 = smov %s830_s17 }
 0x16a   : > { %s1234_s16 = smov %s834_s18  ;;  %s1235_s17 = smov %s1238_s21 }
 0x16b   : > { %s1236_s18 = smov %s1242_s22  ;;  %16 = sbr.rel (!%p14_p3) target bundleno = 5 (0x5), region = 91 }
 0x170   :  { %552 = vsyncpa [#allocation5], 1 }
 0x171   :  { %554 = vsyncpa [#allocation5 + $0x1], 1 }

</bundles_post_ra>
